<compile_context>
chip_gen: v5e
topology: v5e:2x2
jax: 0.10.0
libtpu: 0.0.40
codegen_flags: <defaults>
</compile_context>

<pallas_src>
import jax
import jax.numpy as jnp
from jax.experimental import pallas as pl
from jax.experimental.pallas import tpu as pltpu

_LANE_CANDIDATES = (1024, 512, 256, 128)   # multiples of 128 -> unmasked vld/vst
_MAX_TILE_BYTES = 4 * 1024 * 1024          # 4 MiB tile; 2 arrays x 2 buffers ≈ 16 MiB VMEM
_VMEM_LIMIT_BYTES = 32 * 1024 * 1024       # explicit scoped-VMEM limit, legal on v5e/v6e/v7x


def _identity_kernel(x_ref, o_ref):
    # Pure pass-through: load the current VMEM tile and store it unchanged.
    o_ref[...] = x_ref[...]


def _round_up(n: int, m: int) -> int:
    return (n + m - 1) // m * m


def _run_identity(x2d: jnp.ndarray) -> jnp.ndarray:
    """Tiled, lane-dense identity copy over a 2-D (rows, lanes) slab."""
    rows, lanes = x2d.shape
    itemsize = jnp.dtype(x2d.dtype).itemsize

    # Largest tile (rows) that keeps each tile <= _MAX_TILE_BYTES, multiple of 32.
    max_rows_by_bytes = max(32, (_MAX_TILE_BYTES // (lanes * itemsize)) // 32 * 32)

    if rows <= 32:
        # Tiny input: one full-array block (block == full dims is always legal).
        tile_rows = rows
    else:
        # At least 2 grid steps so both v7x TensorCores get work; multiple of 32
        # so sub-32-bit dtypes never see packed partial tiles.
        half = _round_up(pl.cdiv(rows, 2), 32)
        tile_rows = min(max_rows_by_bytes, half)

    grid = (pl.cdiv(rows, tile_rows),)  # ragged last block handled by Pallas

    return pl.pallas_call(
        _identity_kernel,
        out_shape=jax.ShapeDtypeStruct((rows, lanes), x2d.dtype),
        grid_spec=pl.GridSpec(
            grid=grid,
            in_specs=[pl.BlockSpec((tile_rows, lanes), lambda i: (i, 0))],
            out_specs=pl.BlockSpec((tile_rows, lanes), lambda i: (i, 0)),
        ),
        compiler_params=pltpu.CompilerParams(
            dimension_semantics=("parallel",),     # shards copy across v7x's 2 TCs
            vmem_limit_bytes=_VMEM_LIMIT_BYTES,
        ),
        cost_estimate=pl.CostEstimate(
            flops=0,
            transcendentals=0,
            bytes_accessed=2 * rows * lanes * itemsize,
        ),
    )(x2d)


def base_model_forward(x: jnp.ndarray):
    """Pallas equivalent of BaseModel.forward.

    The reference forward() is `pass` (returns None).  We run a lane-dense,
    tiled identity Pallas kernel over the input (so the data path is exercised
    on TPU) and return (None, identity_copy): the first element mirrors the
    PyTorch semantics, the second lets callers verify the kernel ran.
    """
    orig_shape = x.shape
    total = x.size

    if total == 0:
        # Empty input: nothing to copy, no kernel needed.
        return None, x

    flat = x.reshape(-1)  # reshape of contiguous data: no HBM copy

    # Prefer a lane width that divides the element count exactly -> zero pad,
    # zero slice, minimal 2x-bytes HBM traffic.
    lanes = next((c for c in _LANE_CANDIDATES if total % c == 0), None)

    if lanes is not None:
        out2d = _run_identity(flat.reshape(total // lanes, lanes))
        identity = out2d.reshape(orig_shape)
    else:
        # Rare fallback: element count not a multiple of 128.  Pad only the flat
        # vector up to the next 128 multiple (one extra pass, unavoidable here).
        # TODO(synk): allow_input_fusion could fuse this pad into the input DMA.
        lanes = 128
        padded_total = _round_up(total, lanes)
        flat_p = jnp.pad(flat, (0, padded_total - total))
        out2d = _run_identity(flat_p.reshape(padded_total // lanes, lanes))
        identity = out2d.reshape(-1)[:total].reshape(orig_shape)

    # forward() in the reference module returns None.
    return None, identity


if __name__ == "__main__":
    key = jax.random.PRNGKey(0)

    # Primary test: small shape consistent with the (shape-agnostic) module.
    x = jax.random.normal(key, (2, 4, 16, 16), dtype=jnp.float32)
    fwd_result, identity = base_model_forward(x)
    jax.block_until_ready(identity)

    assert fwd_result is None            # matches PyTorch BaseModel.forward semantics
    assert identity.shape == x.shape
    assert bool(jnp.allclose(identity, x))

    # Secondary test: exercises the ragged-last-block grid path (rows=375,
    # tile_rows=192, grid=(2,)) with no wrapper-side pad or slice.
    y = jax.random.normal(jax.random.PRNGKey(1), (300, 640), dtype=jnp.float32)
    _, identity_y = base_model_forward(y)
    jax.block_until_ready(identity_y)
    assert identity_y.shape == y.shape
    assert bool(jnp.allclose(identity_y, y))

    print("KERNEL_OK")
</pallas_src>

<mosaic_0001>
module attributes {stable_mosaic.version = 11 : i64} {
  func.func @_identity_kernel(%arg0: i32, %arg1: memref<2x1024xf32, #tpu.memory_space<vmem>>, %arg2: memref<2x1024xf32, #tpu.memory_space<vmem>>) attributes {dimension_semantics = [#tpu.dimension_semantics<parallel>], iteration_bounds = array<i64: 1>, scalar_prefetch = 0 : i64, scratch_operands = 0 : i64, tpu.core_type = #tpu.core_type<tc>, window_params = [{transform_indices = @transform_0, window_bounds = array<i64: 2, 1024>}, {transform_indices = @transform_1, window_bounds = array<i64: 2, 1024>}]} {
    %c0 = arith.constant 0 : index
    %c0_0 = arith.constant 0 : index
    %0 = vector.load %arg1[%c0, %c0_0] : memref<2x1024xf32, #tpu.memory_space<vmem>>, vector<2x1024xf32>
    %c0_1 = arith.constant 0 : index
    %c0_2 = arith.constant 0 : index
    %1 = vector.load %arg2[%c0_1, %c0_2] : memref<2x1024xf32, #tpu.memory_space<vmem>>, vector<2x1024xf32>
    tpu.vector_store %arg2[%c0_1, %c0_2], %0 {strides = array<i32>} : memref<2x1024xf32, #tpu.memory_space<vmem>>, vector<2x1024xf32>,
    return
  }
  func.func @transform_0(%arg0: i32) -> (i32, i32) {
    %c0_i32 = arith.constant 0 : i32
    %c0_i32_0 = arith.constant 0 : i32
    return %arg0, %c0_i32 : i32, i32
  }
  func.func @transform_1(%arg0: i32) -> (i32, i32) {
    %c0_i32 = arith.constant 0 : i32
    %c0_i32_0 = arith.constant 0 : i32
    return %arg0, %c0_i32 : i32, i32
  }
}

</mosaic_0001>

<bundles_post_ra>
// kernel: tpu_custom_call.1
= control target key start
LH: loop header
LB: loop body
LE: loop exit
PB: predicated region body
PF: predicated region fallthrough
CT: control target
= control target key end

     0   :  { %6 = vsyncpa [#allocation3], 0  ;;  %s116_s0 = inlined_call_operand.hbm [shape: f32[2,1024], index: 0, kind: input, shape index: {}]   ;;  %s117_s1 = inlined_call_operand.hbm [shape: f32[2,1024], index: 1, kind: output, shape index: {}]  }
   0x1   :  { %7 = vsyncpa [#allocation4], 0  ;;  %s13_s8 = sshll.u32 %s116_s0, 4  ;;  %s98_s9 = smov [#allocation2]   ;;  %s14_s8 = int_to_ptr.hbm [resolvable:$true] %s13_s8 }
   0x2   :  { %s15_s10 = sshll.u32 %s98_s9, 4  ;;  %s16_s10 = int_to_ptr.vmem [resolvable:$true] %s15_s10 }
   0x3   :  { %18 = dma.hbm_to_vmem [thread:$0]  %s14_s8, 256, %s16_s10, [#allocation3]  }
   0x4   :  { %94 = dma.done.wait [#allocation3], 256  }
   0x5   :  { %95 = vsyncadd [#allocation3], 4294967040  ;;  %s99_s11 = smov [#allocation5]   ;;  %s34_s15 = sshll.u32 %s117_s1, 4  ;;  %v23_v0 = vld [vmem:[#allocation2] sm:$0xff]  ;;  %v24_v1 = vld [vmem:[#allocation2 + $0x8] sm:$0xff]  ;;  %s35_s15 = int_to_ptr.hbm [resolvable:$true] %s34_s15 }
   0x6   :  { %s32_s12 = sshll.u32 %s99_s11, 4  ;;  %25 = vst [vmem:[#allocation5] sm:$0xff] %v23_v0  ;;  %s33_s12 = int_to_ptr.vmem [resolvable:$true] %s32_s12 }
   0x7   :  { %26 = vst [vmem:[#allocation5 + $0x8] sm:$0xff] %v24_v1 }
   0x8   :  { %37 = dma.vmem_to_hbm [thread:$0]  %s33_s12, 256, %s35_s15, [#allocation4]  }
   0x9   :  { %96 = dma.done.wait [#allocation4], 256  }
   0xa   :  { %97 = vsyncadd [#allocation4], 4294967040 }
   0xb   :  { %42 = vsyncpa [#allocation3], 1 }
   0xc   :  { %43 = vsyncpa [#allocation4], 1 }

</bundles_post_ra>
